<compile_context>
chip_gen: v5e
topology: v5e:2x2
jax: 0.10.0
libtpu: 0.0.40
codegen_flags: <defaults>
</compile_context>

<pallas_src>
import functools
import math

import jax
import jax.numpy as jnp
import numpy as np
from jax.experimental import pallas as pl
from jax.experimental.pallas import tpu as pltpu


# ----------------------------- kernels ------------------------------------ #

def conv_fc_kernel(cols_ref, wk_ref, cb_ref, wfc_ref, bfc_ref, feats_ref, y_ref):
    """Per-batch backbone stub: 3x3 conv as ONE (HW, 9*Cin)@(9*Cin, Cout)
    matmul + ReLU, AdaptiveAvgPool2d((1,1)) as an XLU mean reduction, fc head.

    Grid: (B,), "parallel" (each step handles one batch element).
      cols_ref : (1, HW, 9*Cin)   im2col slab for this batch element
      wk_ref   : (9*Cin, Cout)    conv weights, taps folded into K
      cb_ref   : (1, Cout)
      wfc_ref  : (Cout, ncls),  bfc_ref: (1, ncls)
      feats_ref: (1, HW, Cout)    NHWC-flattened features (row = (h, w))
      y_ref    : (1, 1, ncls)
    """
    cols = cols_ref[0]                                           # (HW, 9*Cin)
    feats = jnp.maximum(
        jnp.dot(cols, wk_ref[...], preferred_element_type=jnp.float32)
        + cb_ref[...], 0.0)                                      # (HW, Cout)
    feats_ref[0] = feats
    # AdaptiveAvgPool2d((1,1)) == mean over spatial rows; XLU sublane reduce
    # (the pool matrix + degenerate MXU matmul of rev 2 is gone).
    pooled = jnp.mean(feats, axis=0, keepdims=True)              # (1, Cout)
    y_ref[0] = jnp.dot(pooled, wfc_ref[...],
                       preferred_element_type=jnp.float32) + bfc_ref[...]
    # TODO(synk): production — build the im2col tile in-kernel from a padded
    # NHWC VMEM block (9 static shifted slices) and pad Cout/ncls up to a
    # lane-dense multiple of 128 to avoid masked vst.msk stores.


def flow_kernel(nk, j_ref, k_ref, nf_ref, wl_ref, bf_ref, z_ref, lp_ref):
    """Compacted lower-triangular affine flow + standard-normal log-prob.

    grid = (n_blocks,), one step per nonzero (k >= j) block of the
    lower-triangular L, j-major.  The z output block index (0, j) is constant
    across a j-range, so z is accumulated directly in the resident output
    buffer (bias folded into the first step).  logpz partials are written once
    per j-range into lp (J, B, 1) and reduced by XLA outside the kernel.

      nf_ref : (B, t)   f32 contraction tile k of the flattened features
      wl_ref : (t, t)   bf16 block (k, j) of L        (halved HBM traffic)
      bf_ref : (1, t)   f32 bias tile j
      z_ref  : (B, t)   f32 output tile j (resident accumulator)
      lp_ref : (1, B, 1) per-j logpz partial
    """
    s = pl.program_id(0)
    j = j_ref[s]
    k = k_ref[s]

    contrib = jnp.dot(nf_ref[...], wl_ref[...].astype(jnp.float32),
                      preferred_element_type=jnp.float32)

    @pl.when(k == j)                     # first block of this output tile
    def _():
        z_ref[...] = bf_ref[...] + contrib

    @pl.when(k != j)
    def _():
        z_ref[...] += contrib

    @pl.when(k == nk - 1)                # last block of this output tile
    def _():
        zt = z_ref[...]
        logZ = -0.5 * math.log(2.0 * math.pi)
        lp_ref[0] = jnp.sum(logZ - 0.5 * zt * zt, axis=1, keepdims=True)
    # TODO(synk): on v7x, split the compacted block list into two chunks on a
    # leading core-parallel axis to use the 2nd TensorCore.


# ----------------------------- wrapper ------------------------------------ #

def dhm_forward(x_nchw, params, *, flow_tile=256):
    B, Cin, H, W = x_nchw.shape
    Cout = params["conv_w"].shape[-1]
    ncls = params["fc_w"].shape[-1]
    HW = H * W
    D = Cout * HW

    # ---- glue: NCHW -> NHWC, zero-pad, per-batch im2col slab ---------------
    x = jnp.transpose(x_nchw, (0, 2, 3, 1)).astype(jnp.float32)        # NHWC
    xp = jnp.pad(x, ((0, 0), (1, 1), (1, 1), (0, 0)))
    cols = jnp.concatenate(
        [xp[:, kh:kh + H, kw:kw + W, :].reshape(B, HW, Cin)
         for kh in range(3) for kw in range(3)], axis=2)        # (B, HW, 9*Cin)
    # TODO(synk): at production sizes build this slab inside the kernel from a
    # padded-x VMEM block (9x HBM traffic + XLA concat latency otherwise).
    wk = params["conv_w"].reshape(9 * Cin, Cout)

    conv_cost = pl.CostEstimate(
        flops=2 * B * HW * 9 * Cin * Cout + 2 * B * HW * Cout + 2 * B * Cout * ncls,
        transcendentals=0,
        bytes_accessed=4 * (B * HW * 9 * Cin + 9 * Cin * Cout + Cout
                            + Cout * ncls + ncls + B * HW * Cout + B * ncls))

    feats, y3 = pl.pallas_call(
        conv_fc_kernel,
        out_shape=(jax.ShapeDtypeStruct((B, HW, Cout), jnp.float32),
                   jax.ShapeDtypeStruct((B, 1, ncls), jnp.float32)),
        grid=(B,),
        in_specs=[pl.BlockSpec((1, HW, 9 * Cin), lambda b: (b, 0, 0)),
                  pl.BlockSpec((9 * Cin, Cout), lambda b: (0, 0)),
                  pl.BlockSpec((1, Cout), lambda b: (0, 0)),
                  pl.BlockSpec((Cout, ncls), lambda b: (0, 0)),
                  pl.BlockSpec((1, ncls), lambda b: (0, 0))],
        out_specs=(pl.BlockSpec((1, HW, Cout), lambda b: (b, 0, 0)),
                   pl.BlockSpec((1, 1, ncls), lambda b: (b, 0, 0))),
        compiler_params=pltpu.CompilerParams(dimension_semantics=("parallel",)),
        cost_estimate=conv_cost,
    )(cols, wk, params["conv_b"].reshape(1, Cout),
      params["fc_w"], params["fc_b"].reshape(1, ncls))
    y = y3.reshape(B, ncls)

    # nf in NHWC-flattened (spatial-major) order: a FREE row-major reshape —
    # no transpose, no extra HBM round trip.  The NCHW flatten order required
    # by nf_features.view(B, -1) is folded into flow_w_kernel (row-permuted L).
    nf_spatial = feats.reshape(B, D)

    t = flow_tile
    assert D % t == 0, "flow_tile must divide D"
    nt = D // t                                     # tiles per side (J == K)
    # Compacted lower-triangular schedule, j-major (output tile j resident
    # across its contraction range k = j .. nt-1).  Scalar-prefetched to SMEM.
    pairs = [(j, k) for j in range(nt) for k in range(j, nt)]
    n_blocks = len(pairs)                           # nt*(nt+1)//2
    j_idx = jnp.asarray([p[0] for p in pairs], jnp.int32)
    k_idx = jnp.asarray([p[1] for p in pairs], jnp.int32)

    flow_cost = pl.CostEstimate(
        flops=2 * B * t * t * n_blocks + 4 * B * D,
        transcendentals=0,
        bytes_accessed=(2 * n_blocks * t * t           # bf16 L blocks
                        + 4 * n_blocks * B * t          # nf tile re-reads
                        + 4 * D + 4 * B * D + 4 * nt * B))

    grid_spec = pltpu.PrefetchScalarGridSpec(
        num_scalar_prefetch=2,
        grid=(n_blocks,),
        in_specs=[
            pl.BlockSpec((B, t), lambda s, jv, kv: (0, kv[s])),      # nf
            pl.BlockSpec((t, t), lambda s, jv, kv: (kv[s], jv[s])),  # L (bf16)
            pl.BlockSpec((1, t), lambda s, jv, kv: (0, jv[s])),      # bias
        ],
        out_specs=(
            pl.BlockSpec((B, t), lambda s, jv, kv: (0, jv[s])),      # z
            pl.BlockSpec((1, B, 1), lambda s, jv, kv: (jv[s], 0, 0)),  # logpz partials
        ),
    )

    # NOTE(production tiling): raise flow_tile per generation — t <= 1024 on
    # v7x (64 MiB physical VMEM), up to ~2048 on v5e/v6e with
    # vmem_limit_bytes raised past the 16/32 MiB scoped defaults.
    z, lp = pl.pallas_call(
        functools.partial(flow_kernel, nt),
        out_shape=(jax.ShapeDtypeStruct((B, D), jnp.float32),
                   jax.ShapeDtypeStruct((nt, B, 1), jnp.float32)),
        grid_spec=grid_spec,
        compiler_params=pltpu.CompilerParams(
            dimension_semantics=("arbitrary",)),
        cost_estimate=flow_cost,
    )(j_idx, k_idx, nf_spatial, params["flow_w_kernel"],
      params["flow_b"].reshape(1, D))

    logpz = jnp.sum(lp, axis=0)            # (B, 1) — per-tile partials reduced

    # logdet = init_probs (zeros, since normalise_features=False) + log|det Wf|
    # — a data-independent broadcast constant, so no kernel is needed.
    logdet = jnp.zeros((B, 1), jnp.float32) + params["flow_logdiag_sum"]

    # forward(...) returns (y, logpz, logdet, z, None)
    return y, logpz, logdet, z, None


# ------------------------- deterministic params ---------------------------- #

def init_params(key, Cin, Cout, H, W, ncls):
    HW = H * W
    D = Cout * HW
    ks = jax.random.split(key, 6)
    conv_w = 0.1 * jax.random.normal(ks[0], (3, 3, Cin, Cout), jnp.float32)
    conv_b = 0.1 * jax.random.normal(ks[1], (Cout,), jnp.float32)
    fc_w = 0.1 * jax.random.normal(ks[2], (Cout, ncls), jnp.float32)
    fc_b = 0.1 * jax.random.normal(ks[3], (ncls,), jnp.float32)

    # Flow weight Wf = P @ L: L lower-triangular with positive diagonal in the
    # NHWC-flatten basis, P the NCHW<->NHWC flatten-order permutation.
    # log|det Wf| = sum(log diag L).  L is STORED in bf16 (the flow matmul is
    # HBM-bandwidth-bound on L); both kernel and reference use the bf16 values.
    raw = 0.02 * jax.random.normal(ks[4], (D, D), jnp.float32)
    diag = 0.5 + jnp.abs(jnp.diag(raw))                 # strictly positive diag
    L = jnp.tril(raw, k=-1) + jnp.diag(diag)            # lower-triangular, f32
    L_bf16 = L.astype(jnp.bfloat16)
    L_q = L_bf16.astype(jnp.float32)                    # quantised values

    idx = np.arange(D)
    c, hw = idx // HW, idx % HW
    sigma = hw * Cout + c                 # channel-major index -> spatial-major
    flow_w = L_q[sigma, :]                # weight in PyTorch (C,H,W)-flatten basis
    flow_b = 0.02 * jax.random.normal(ks[5], (D,), jnp.float32)
    return {
        "conv_w": conv_w, "conv_b": conv_b,
        "fc_w": fc_w, "fc_b": fc_b,
        "flow_w": flow_w,                 # used by the pure-JAX reference
        "flow_w_kernel": L_bf16,          # bf16, row-permutation folded out
        "flow_b": flow_b,
        "flow_logdiag_sum": jnp.sum(jnp.log(jnp.diag(L_q))),
    }


# ------------------------------ reference ---------------------------------- #

def dhm_forward_ref(x_nchw, params):
    """Pure-JAX reference (high precision) mirroring the PyTorch forward."""
    B, Cin, H, W = x_nchw.shape
    Cout = params["conv_w"].shape[-1]
    D = Cout * H * W
    x = jnp.transpose(x_nchw, (0, 2, 3, 1)).astype(jnp.float32)
    xp = jnp.pad(x, ((0, 0), (1, 1), (1, 1), (0, 0)))
    acc = jnp.zeros((B, H, W, Cout), jnp.float32)
    for kh in range(3):
        for kw in range(3):
            acc = acc + jnp.einsum(
                "bhwi,io->bhwo",
                xp[:, kh:kh + H, kw:kw + W, :],
                params["conv_w"][kh, kw],
                precision=jax.lax.Precision.HIGHEST)
    feats = jnp.maximum(acc + params["conv_b"], 0.0)                   # NHWC
    pooled = jnp.mean(feats, axis=(1, 2))                              # (B, C)
    y = pooled @ params["fc_w"] + params["fc_b"]
    nf = jnp.transpose(feats, (0, 3, 1, 2)).reshape(B, D)              # NCHW flatten
    z = jnp.dot(nf, params["flow_w"],
                precision=jax.lax.Precision.HIGHEST) + params["flow_b"]
    logZ = -0.5 * math.log(2.0 * math.pi)
    logpz = jnp.sum(logZ - z * z / 2.0, axis=1, keepdims=True)
    logdet = jnp.zeros((B, 1), jnp.float32) + params["flow_logdiag_sum"]
    return y, logpz, logdet, z


# --------------------------------- main ------------------------------------ #

if __name__ == "__main__":
    B, Cin, H, W = 2, 4, 8, 8          # PyTorch NCHW input
    Cout, ncls = 32, 10                # flow_in_shape -> [8, 8, 32], D = 2048

    key = jax.random.PRNGKey(0)
    kx, kp = jax.random.split(key)
    x = jax.random.normal(kx, (B, Cin, H, W), jnp.float32)
    params = init_params(kp, Cin, Cout, H, W, ncls)

    y, logpz, logdet, z, _ = jax.block_until_ready(dhm_forward(x, params))

    # sanity check against the pure-JAX reference
    y_r, logpz_r, logdet_r, z_r = dhm_forward_ref(x, params)
    np.testing.assert_allclose(np.asarray(y), np.asarray(y_r), rtol=5e-3, atol=5e-3)
    np.testing.assert_allclose(np.asarray(z), np.asarray(z_r), rtol=5e-3, atol=5e-3)
    np.testing.assert_allclose(np.asarray(logdet), np.asarray(logdet_r),
                               rtol=1e-5, atol=1e-5)
    np.testing.assert_allclose(np.asarray(logpz), np.asarray(logpz_r),
                               rtol=1e-3, atol=1e-1)

    assert y.shape == (B, ncls) and z.shape == (B, Cout * H * W)
    assert logpz.shape == (B, 1) and logdet.shape == (B, 1)
    assert np.all(np.isfinite(np.asarray(y))) and np.all(np.isfinite(np.asarray(z)))

    print("KERNEL_OK")
</pallas_src>

<mosaic_0001>
module attributes {stable_mosaic.version = 11 : i64} {
  func.func @conv_fc_kernel(%arg0: i32, %arg1: memref<1x64x36xf32, #tpu.memory_space<vmem>>, %arg2: memref<36x32xf32, #tpu.memory_space<vmem>>, %arg3: memref<1x32xf32, #tpu.memory_space<vmem>>, %arg4: memref<32x10xf32, #tpu.memory_space<vmem>>, %arg5: memref<1x10xf32, #tpu.memory_space<vmem>>, %arg6: memref<1x64x32xf32, #tpu.memory_space<vmem>>, %arg7: memref<1x1x10xf32, #tpu.memory_space<vmem>>) attributes {dimension_semantics = [#tpu.dimension_semantics<parallel>], iteration_bounds = array<i64: 2>, scalar_prefetch = 0 : i64, scratch_operands = 0 : i64, tpu.core_type = #tpu.core_type<tc>, window_params = [{transform_indices = @transform_0, window_bounds = array<i64: 1, 64, 36>}, {pipeline_mode = #tpu.pipeline_mode<synchronous>, transform_indices = @transform_1, window_bounds = array<i64: 36, 32>}, {pipeline_mode = #tpu.pipeline_mode<synchronous>, transform_indices = @transform_2, window_bounds = array<i64: 1, 32>}, {pipeline_mode = #tpu.pipeline_mode<synchronous>, transform_indices = @transform_3, window_bounds = array<i64: 32, 10>}, {pipeline_mode = #tpu.pipeline_mode<synchronous>, transform_indices = @transform_4, window_bounds = array<i64: 1, 10>}, {transform_indices = @transform_5, window_bounds = array<i64: 1, 64, 32>}, {transform_indices = @transform_6, window_bounds = array<i64: 1, 1, 10>}]} {
    %c0 = arith.constant 0 : index
    %c0_0 = arith.constant 0 : index
    %c0_1 = arith.constant 0 : index
    %0 = vector.load %arg1[%c0, %c0_0, %c0_1] : memref<1x64x36xf32, #tpu.memory_space<vmem>>, vector<1x64x36xf32>
    %1 = vector.shape_cast %0 : vector<1x64x36xf32> to vector<64x36xf32>
    %c0_2 = arith.constant 0 : index
    %c0_3 = arith.constant 0 : index
    %2 = vector.load %arg2[%c0_2, %c0_3] : memref<36x32xf32, #tpu.memory_space<vmem>>, vector<36x32xf32>
    %cst = arith.constant dense<0.000000e+00> : vector<64x32xf32>
    %3 = tpu.matmul %1, %2, %cst {dimension_numbers = #tpu.dot_dimension_numbers<[1], [0], [0], [1], [0, 0, 1, 1], [], []>} : vector<64x36xf32>, vector<36x32xf32>, vector<64x32xf32> -> vector<64x32xf32>
    %c0_4 = arith.constant 0 : index
    %c0_5 = arith.constant 0 : index
    %4 = vector.load %arg3[%c0_4, %c0_5] : memref<1x32xf32, #tpu.memory_space<vmem>>, vector<1x32xf32>
    %5 = vector.broadcast %4 : vector<1x32xf32> to vector<64x32xf32>
    %6 = arith.addf %3, %5 : vector<64x32xf32>
    %cst_6 = arith.constant 0.000000e+00 : f32
    %7 = vector.broadcast %cst_6 : f32 to vector<64x32xf32>
    %8 = arith.maximumf %6, %7 : vector<64x32xf32>
    %c0_7 = arith.constant 0 : index
    %c0_8 = arith.constant 0 : index
    %c0_9 = arith.constant 0 : index
    %9 = vector.load %arg6[%c0_7, %c0_8, %c0_9] : memref<1x64x32xf32, #tpu.memory_space<vmem>>, vector<1x64x32xf32>
    %10 = vector.shape_cast %9 : vector<1x64x32xf32> to vector<64x32xf32>
    %11 = vector.shape_cast %8 : vector<64x32xf32> to vector<1x64x32xf32>
    tpu.vector_store %arg6[%c0_7, %c0_8, %c0_9], %11 {strides = array<i32>} : memref<1x64x32xf32, #tpu.memory_space<vmem>>, vector<1x64x32xf32>,
    %cst_10 = arith.constant dense<0.000000e+00> : vector<32xf32>
    %12 = vector.multi_reduction <add>, %8, %cst_10 [0] : vector<64x32xf32> to vector<32xf32>
    %13 = vector.shape_cast %12 : vector<32xf32> to vector<1x32xf32>
    %cst_11 = arith.constant 6.400000e+01 : f32
    %14 = vector.broadcast %cst_11 : f32 to vector<1x32xf32>
    %15 = arith.divf %13, %14 : vector<1x32xf32>
    %c0_12 = arith.constant 0 : index
    %c0_13 = arith.constant 0 : index
    %16 = vector.load %arg4[%c0_12, %c0_13] : memref<32x10xf32, #tpu.memory_space<vmem>>, vector<32x10xf32>
    %cst_14 = arith.constant dense<0.000000e+00> : vector<1x10xf32>
    %17 = tpu.matmul %15, %16, %cst_14 {dimension_numbers = #tpu.dot_dimension_numbers<[1], [0], [0], [1], [0, 0, 1, 1], [], []>} : vector<1x32xf32>, vector<32x10xf32>, vector<1x10xf32> -> vector<1x10xf32>
    %c0_15 = arith.constant 0 : index
    %c0_16 = arith.constant 0 : index
    %18 = vector.load %arg5[%c0_15, %c0_16] : memref<1x10xf32, #tpu.memory_space<vmem>>, vector<1x10xf32>
    %19 = arith.addf %17, %18 : vector<1x10xf32>
    %c0_17 = arith.constant 0 : index
    %c0_18 = arith.constant 0 : index
    %c0_19 = arith.constant 0 : index
    %20 = vector.load %arg7[%c0_17, %c0_18, %c0_19] : memref<1x1x10xf32, #tpu.memory_space<vmem>>, vector<1x1x10xf32>
    %21 = vector.shape_cast %20 : vector<1x1x10xf32> to vector<1x10xf32>
    %22 = vector.shape_cast %19 : vector<1x10xf32> to vector<1x1x10xf32>
    tpu.vector_store %arg7[%c0_17, %c0_18, %c0_19], %22 {strides = array<i32>} : memref<1x1x10xf32, #tpu.memory_space<vmem>>, vector<1x1x10xf32>,
    return
  }
  func.func @transform_0(%arg0: i32) -> (i32, i32, i32) {
    %c0_i32 = arith.constant 0 : i32
    %c0_i32_0 = arith.constant 0 : i32
    %c0_i32_1 = arith.constant 0 : i32
    return %arg0, %c0_i32, %c0_i32_0 : i32, i32, i32
  }
  func.func @transform_1(%arg0: i32) -> (i32, i32) {
    %c0_i32 = arith.constant 0 : i32
    %c0_i32_0 = arith.constant 0 : i32
    %c0_i32_1 = arith.constant 0 : i32
    return %c0_i32, %c0_i32_0 : i32, i32
  }
  func.func @transform_2(%arg0: i32) -> (i32, i32) {
    %c0_i32 = arith.constant 0 : i32
    %c0_i32_0 = arith.constant 0 : i32
    %c0_i32_1 = arith.constant 0 : i32
    return %c0_i32, %c0_i32_0 : i32, i32
  }
  func.func @transform_3(%arg0: i32) -> (i32, i32) {
    %c0_i32 = arith.constant 0 : i32
    %c0_i32_0 = arith.constant 0 : i32
    %c0_i32_1 = arith.constant 0 : i32
    return %c0_i32, %c0_i32_0 : i32, i32
  }
  func.func @transform_4(%arg0: i32) -> (i32, i32) {
    %c0_i32 = arith.constant 0 : i32
    %c0_i32_0 = arith.constant 0 : i32
    %c0_i32_1 = arith.constant 0 : i32
    return %c0_i32, %c0_i32_0 : i32, i32
  }
  func.func @transform_5(%arg0: i32) -> (i32, i32, i32) {
    %c0_i32 = arith.constant 0 : i32
    %c0_i32_0 = arith.constant 0 : i32
    %c0_i32_1 = arith.constant 0 : i32
    return %arg0, %c0_i32, %c0_i32_0 : i32, i32, i32
  }
  func.func @transform_6(%arg0: i32) -> (i32, i32, i32) {
    %c0_i32 = arith.constant 0 : i32
    %c0_i32_0 = arith.constant 0 : i32
    %c0_i32_1 = arith.constant 0 : i32
    return %arg0, %c0_i32, %c0_i32_0 : i32, i32, i32
  }
}

</mosaic_0001>

<bundles_post_ra>
// kernel: tpu_custom_call.1
= control target key start
LH: loop header
LB: loop body
LE: loop exit
PB: predicated region body
PF: predicated region fallthrough
CT: control target
= control target key end

     0   :  { %12 = vsyncpa [#allocation3], 0  ;;  %s864_s0 = inlined_call_operand.vmem [shape: f32[2,64,36], index: 0, kind: input, shape index: {}]   ;;  %s865_s1 = inlined_call_operand.vmem [shape: f32[36,32], index: 1, kind: input, shape index: {}]   ;;  %s866_s2 = inlined_call_operand.vmem [shape: f32[1,32], index: 2, kind: input, shape index: {}]   ;;  %s867_s3 = inlined_call_operand.vmem [shape: f32[32,10], index: 3, kind: input, shape index: {}]   ;;  %s868_s4 = inlined_call_operand.vmem [shape: f32[1,10], index: 4, kind: input, shape index: {}]   ;;  %s869_s5 = inlined_call_operand.vmem [shape: f32[2,64,32], index: 5, kind: output, shape index: {0}]   ;;  %s870_s6 = inlined_call_operand.hbm [shape: f32[2,1,10], index: 6, kind: output, shape index: {1}]  }
   0x1   :  { %14 = vsyncpa [#allocation3 + $0x1], 0  ;;  %s701_s21 = smov 0   ;;  %s703_s22 = smov 0  }
   0x2   :  { %s705_s23 = smov 0   ;;  %s707_s24 = smov 0  }
   0x3 LB: > { %s722_s25 = sadd.s32 4294967295, %s663_s24   ;;  %s526_s26 = sadd.s32 4294967294, %s663_s24   ;;  %s663_s24 = sphi %s707_s24, %s876_s24   ;;  %s659_s23 = sphi %s705_s23, %s875_s23   ;;  %s655_s22 = sphi %s703_s22, %s874_s22   ;;  %s651_s21 = sphi %s701_s21, %s873_s21  }
   0x4   : > { %s726_s27 = sadd.s32 1, %s663_s24   ;;  %s163_s28 = sadd.s32 1, %s659_s23 }
   0x5   : > { %s160_s29 = ssub.s32 %s663_s24, %s726_s27  ;;  %p173_p0 = scmp.ne.s32.totalorder %s659_s23, %s655_s22 }
   0x6   : > { %p161_p1 = scmp.eq.s32.totalorder %s160_s29, 0  ;;  %p174_p2 = scmp.eq.s32.totalorder %s722_s25, 1 }
   0x7   : > { %p179_p3 = scmp.ne.s32.totalorder %s655_s22, %s651_s21  ;;  %p180_p4 = scmp.eq.s32.totalorder %s526_s26, 1 }
   0x8   : > { %s737_s30 = scalar_select %p161_p1, %s659_s23, %s163_s28  }
   0x9   : > { %p739_p5 = por %p174_p2, %p173_p0  ;;  %p743_p6 = por %p180_p4, %p179_p3 }
   0xa   : > { %p529_p7 = scmp.ge.s32.totalorder %s663_s24, 1  ;;  %p218_p8 = scmp.lt.s32.totalorder %s663_s24, 3 }
   0xc   : > { %p219_p9 = pnand %p529_p7, %p218_p8 }
   0xd   : > { %p252_p10 = scmp.lt.s32.totalorder (!%p219_p9), %s722_s25, 1  ;;  %s250_s28 = sand.u32 (!%p219_p9), 1, %s655_s22  }
   0xe   : > { %222 = sbr.rel (%p219_p9) target bundleno = 335 (0x14f), region = 40  ;;  %s442_s10 = scalar_lea.hbm (!%p219_p9), %s870_s6, %s722_s25 }
   0xf   : > { %s446_s16 = sshll.u32 (!%p219_p9), %s442_s10, 4  ;;  %s621_s20 = scalar_lea.hbm (!%p219_p9), %s870_s6, 2  ;;  %s447_s16 = int_to_ptr.hbm [resolvable:$true] %s446_s16 }
  0x10   : > { %s615_s17 = sshra.s32 (!%p219_p9), %s447_s16, 4  ;;  %s616_s17 = int_to_ptr.hbm [resolvable:$true] %s615_s17 }
  0x11   : > { %p622_p0 = scmp.lt.s32.totalorder (!%p219_p9), %s616_s17, %s870_s6 }
  0x13   : > { %v274_v0 = vld [vmem:[%s865_s1 + $0x20] sm:$0xf]  ;;  %vm304_vm0 = vcmask 1043456   ;;  %v273_v1 = vld [vmem:[%s865_s1 + $0x18] sm:$0xff]  ;;  %v272_v2 = vld [vmem:[%s865_s1 + $0x10] sm:$0xff]  ;;  %s760_s15 = scalar_select %p252_p10, %s722_s25, 1 }
  0x14   : > { %534 = vmatpush.msk.msra.mxu0 %vm304_vm0, %v274_v0  ;;  %548 = vmatpush.msk.msra.mxu2 %vm304_vm0, %v274_v0  ;;  %v271_v3 = vld [vmem:[%s865_s1 + $0x8] sm:$0xff]  ;;  %v270_v4 = vld [vmem:[%s865_s1] sm:$0xff]  ;;  %vm279_vm1 = vcmask 293888   ;;  %vm357_vm2 = vcmask 261120   ;;  %v398_v21 = vld [vmem:[%s867_s3 + $0x18] sm:$0xff]  ;;  %v665_v39 = vmov 64.0  }
  0x15   : > { %549 = vmatpush.msk.msra.mxu3 %vm304_vm0, %v274_v0  ;;  %s546_s18 = sshll.u32 %s760_s15, 6  ;;  %v598_v13 = vld [vmem:[%s866_s2] ss:$0 sm:$0xff]  ;;  %v397_v22 = vld [vmem:[%s867_s3 + $0x10] sm:$0xff]  ;;  %415 = vmatpush.msra.mxu1 %v398_v21  ;;  %v396_v26 = vld [vmem:[%s867_s3 + $0x8] sm:$0xff]  ;;  %599 = vrcp.f32 %v665_v39  ;;  %vm423_vm4 = vcmask 73728  }
  0x16   : > { %320 = vmatpush.msra.mxu0 %v273_v1  ;;  %550 = vmatpush.msra.mxu2 %v273_v1  ;;  %s256_s26 = scalar_lea.vmem %s864_s0, %s546_s18  ;;  %s790_s13 = scalar_lea.vmem %s869_s5, %s546_s18  ;;  %v395_v29 = vld [vmem:[%s867_s3] sm:$0xff] }
  0x17   : > { %551 = vmatpush.msra.mxu3 %v273_v1  ;;  %v262_v5 = vld [vmem:[%s256_s26] sm:$0xff]  ;;  %v264_v6 = vld [vmem:[%s256_s26 + $0x10] sm:$0xff]  ;;  %v267_v7 = vld [vmem:[%s256_s26 + $0x28] sm:$0xff]  ;;  %416 = vmatpush.msra.mxu1 %v397_v22  ;;  %s431_s15 = scalar_lea.sflag [#allocation3], %s250_s28  ;;  %s617_s18 = scalar_lea.hbm %s616_s17, 1 }
  0x18   : > { %321 = vmatpush.msra.mxu0 %v272_v2  ;;  %552 = vmatpush.msra.mxu2 %v272_v2  ;;  %v263_v8 = vld [vmem:[%s256_s26 + $0x8] sm:$0xff]  ;;  %v265_v9 = vld [vmem:[%s256_s26 + $0x18] sm:$0xff]  ;;  %v268_v10 = vld [vmem:[%s256_s26 + $0x30] sm:$0xff]  ;;  %p618_p11 = scmp.ne.s32.totalorder %s616_s17, %s617_s18  ;;  %p623_p1 = scmp.lt.s32.totalorder %s621_s20, %s617_s18 }
  0x19   : > { %553 = vmatpush.msra.mxu3 %v272_v2  ;;  %v266_v11 = vld [vmem:[%s256_s26 + $0x20] sm:$0xff]  ;;  %v269_v12 = vld [vmem:[%s256_s26 + $0x38] sm:$0xff]  ;;  %417 = vmatpush.msra.mxu1 %v396_v26 }
  0x1a   : > { %322 = vmatpush.msra.mxu0 %v271_v3  ;;  %554 = vmatpush.msra.mxu2 %v271_v3  ;;  %p619_p12 = pnand %p618_p11, %p739_p5  ;;  %p624_p2 = por %p623_p1, %p622_p0 }
  0x1b   : > { %555 = vmatpush.msra.mxu3 %v271_v3  ;;  %418 = vmatpush.msra.mxu1 %v395_v29  ;;  %v600_v48 = vpop.eup %599 }
  0x1c   : > { %323 = vmatpush.msra.mxu0 %v270_v4  ;;  %556 = vmatpush.msra.mxu2 %v270_v4  ;;  %v388_v54 = vmul.f32 64.0, %v600_v48  ;;  %vm392_vm3 = vweird.f32 %v600_v48  ;;  %p620_p13 = pneg %p619_p12 }
  0x1d   : > { %535 = vmatmul.msk.f32.vlgmr.msra.gmra.mxu0 %vm279_vm1, %v262_v5  ;;  %537 = vmatmul.msk.f32.vlgmr.msra.gmra.mxu2 %vm279_vm1, %v264_v6 }
  0x1e   : > { %557 = vmatpush.msra.mxu3 %v270_v4  ;;  %v389_v59 = vsub.f32 1.0, %v388_v54  ;;  %p625_p3 = pnand %p624_p2, %p620_p13 }
  0x1f   : > { %540 = vmatmul.msk.f32.vlgmr.msra.gmra.mxu3 %vm279_vm1, %v267_v7  ;;  %v399_v7 = vld [vmem:[%s868_s4] sm:$0x1] }
  0x20   : > { %v390_v62 = vmul.f32 %v600_v48, %v389_v59 }
  0x22   : > { %v391_v1 = vadd.f32 %v600_v48, %v390_v62 }
  0x24   : > { %v393_v4 = vsel %vm392_vm3, %v600_v48, %v391_v1 }
  0x25   : > { %536 = vmatmul.msk.f32.gmra.mxu0 %vm279_vm1, %v263_v8  ;;  %538 = vmatmul.msk.f32.gmra.mxu2 %vm279_vm1, %v265_v9 }
  0x27   : > { %541 = vmatmul.msk.f32.gmra.mxu3 %vm279_vm1, %v268_v10 }
  0x2d   : > { %539 = vmatmul.msk.f32.gmra.mxu2 %vm279_vm1, %v266_v11 }
  0x2f   : > { %542 = vmatmul.msk.f32.gmra.mxu3 %vm279_vm1, %v269_v12 }
  0x9a   : > { %v325_v14 = vpop.f32.mrf.mxu0 }
  0x9b   : > { %v326_v15 = vadd.f32 %v598_v13, %v325_v14 }
  0x9d   : > { %v349_v16 = vmax.f32 %v326_v15, 0.0 }
  0x9f   : > { %358 = vst.msk [vmem:[%s790_s13] sm:$0xff] %vm357_vm2, %v349_v16  ;;  %v366_v33 = vsel %vm357_vm2, %v349_v16, 0.0 }
  0xa0   : > { %v331_v17 = vpop.f32.mrf.mxu2 }
  0xa1   : > { %v332_v18 = vadd.f32 %v598_v13, %v331_v17 }
  0xa2   : > { %v328_v19 = vpop.f32.mrf.mxu0  ;;  %v340_v20 = vpop.f32.mrf.mxu3 }
  0xa3   : > { %v351_v23 = vmax.f32 %v332_v18, 0.0  ;;  %v329_v24 = vadd.f32 %v598_v13, %v328_v19  ;;  %v341_v25 = vadd.f32 %v598_v13, %v340_v20 }
  0xa5   : > { %360 = vst.msk [vmem:[%s790_s13 + $0x10] sm:$0xff] %vm357_vm2, %v351_v23  ;;  %v350_v27 = vmax.f32 %v329_v24, 0.0  ;;  %v354_v28 = vmax.f32 %v341_v25, 0.0  ;;  %v369_v41 = vsel %vm357_vm2, %v351_v23, 0.0 }
  0xa7   : > { %359 = vst.msk [vmem:[%s790_s13 + $0x8] sm:$0xff] %vm357_vm2, %v350_v27  ;;  %v367_v34 = vsel %vm357_vm2, %v350_v27, 0.0  ;;  %v375_v53 = vsel %vm357_vm2, %v354_v28, 0.0 }
  0xa8   : > { %363 = vst.msk [vmem:[%s790_s13 + $0x28] sm:$0xff] %vm357_vm2, %v354_v28  ;;  %v334_v30 = vpop.f32.mrf.mxu2  ;;  %v368_v38 = vadd.f32 %v367_v34, %v366_v33 }
  0xa9   : > { %v335_v31 = vadd.f32 %v598_v13, %v334_v30 }
  0xaa   : > { %v343_v32 = vpop.f32.mrf.mxu3  ;;  %v370_v44 = vadd.f32 %v369_v41, %v368_v38 }
  0xab   : > { %v352_v35 = vmax.f32 %v335_v31, 0.0  ;;  %v344_v36 = vadd.f32 %v598_v13, %v343_v32 }
  0xad   : > { %361 = vst.msk [vmem:[%s790_s13 + $0x18] sm:$0xff] %vm357_vm2, %v352_v35  ;;  %v355_v37 = vmax.f32 %v344_v36, 0.0  ;;  %v371_v42 = vsel %vm357_vm2, %v352_v35, 0.0 }
  0xae   : > { %v372_v49 = vadd.f32 %v371_v42, %v370_v44 }
  0xaf   : > { %364 = vst.msk [vmem:[%s790_s13 + $0x30] sm:$0xff] %vm357_vm2, %v355_v37  ;;  %v377_v56 = vsel %vm357_vm2, %v355_v37, 0.0 }
  0xb0   : > { %v337_v40 = vpop.f32.mrf.mxu2 }
  0xb1   : > { %v338_v43 = vadd.f32 %v598_v13, %v337_v40 }
  0xb2   : > { %v346_v45 = vpop.f32.mrf.mxu3 }
  0xb3   : > { %v353_v46 = vmax.f32 %v338_v43, 0.0  ;;  %v347_v47 = vadd.f32 %v598_v13, %v346_v45 }
  0xb5   : > { %362 = vst.msk [vmem:[%s790_s13 + $0x20] sm:$0xff] %vm357_vm2, %v353_v46  ;;  %v373_v50 = vsel %vm357_vm2, %v353_v46, 0.0  ;;  %v356_v51 = vmax.f32 %v347_v47, 0.0 }
  0xb6   : > { %v374_v52 = vadd.f32 %v373_v50, %v372_v49 }
  0xb7   : > { %365 = vst.msk [vmem:[%s790_s13 + $0x38] sm:$0xff] %vm357_vm2, %v356_v51  ;;  %v379_v57 = vsel %vm357_vm2, %v356_v51, 0.0  ;;  %s251_s13 = scalar_lea.vmem [#allocation2], %s250_s28 }
  0xb8   : > { %v376_v55 = vadd.f32 %v375_v53, %v374_v52  ;;  %s444_s14 = sshll.u32 %s251_s13, 4  ;;  %s445_s14 = int_to_ptr.vmem [resolvable:$true] %s444_s14 }
  0xba   : > { %v378_v58 = vadd.f32 %v377_v56, %v376_v55 }
  0xbc   : > { %v380_v60 = vadd.f32 %v379_v57, %v378_v58 }
  0xbe   : > { %v381_v61 = vrot.slane %v380_v60, 4 }
  0xc0   : > { %v382_v63 = vadd.f32 %v381_v61, %v380_v60 }
  0xc2   : > { %v383_v0 = vrot.slane %v382_v63, 2 }
  0xc4   : > { %v384_v2 = vadd.f32 %v383_v0, %v382_v63 }
  0xc6   : > { %v385_v3 = vrot.slane %v384_v2, 1 }
  0xc8   : > { %v386_v5 = vadd.f32 %v385_v3, %v384_v2 }
  0xca   : > { %v394_v6 = vmul.f32 %v393_v4, %v386_v5 }
  0xcc   : > { %543 = vmatmul.msk.f32.vlgmr.msra.gmra.mxu1 %vm357_vm2, %v394_v6 }
 0x149   : > { %v420_v8 = vpop.f32.mrf.mxu1 }
 0x14a   : > { %v421_v9 = vadd.f32 %v420_v8, %v399_v7 }
 0x14c   : > { %424 = vst.msk [vmem:[%s251_s13] sm:$0x1] %vm423_vm4, %v421_v9 }
 0x14d   : > { %628 = shalt.err (!%p625_p3)
}
 0x14e   : > { %558 = dma.vmem_to_hbm [thread:$0]  (%p739_p5), %s445_s14, 16, %s447_s16, %s431_s15  }
 0x14f PF: > { %p564_p4 = scmp.ge.s32.totalorder %s663_s24, 2  ;;  %s466_s28 = sand.u32 1, %s651_s21  }
 0x150   : > { %s467_s9 = scalar_lea.sflag [#allocation3], %s466_s28 }
 0x151   : > { %p561_p7 = pnand %p564_p4, %p743_p6 }
 0x153   : > { %p562_p8 = pneg %p561_p7 }
 0x155   : > { %646 = dma.done.wait (%p562_p8), %s467_s9, 16  }
 0x156   : > { %648 = vsyncadd (%p562_p8), %s467_s9, 4294967280  ;;  %p17_p9 = scmp.ge.s32.totalorder %s726_s27, 4   ;;  %s873_s21 = smov %s655_s22 }
 0x157   : > { %s874_s22 = smov %s659_s23  ;;  %s875_s23 = smov %s737_s30 }
 0x158   : > { %s876_s24 = smov %s726_s27  ;;  %19 = sbr.rel (!%p17_p9) target bundleno = 3 (0x3), region = 87 }
 0x15d   :  { %472 = vsyncpa [#allocation3], 1 }
 0x15e   :  { %474 = vsyncpa [#allocation3 + $0x1], 1 }

</bundles_post_ra>
